<compile_context>
chip_gen: v7x
topology: tpu7x:2x2x1
jax: 0.10.0
libtpu: 0.0.40
codegen_flags: <defaults>
</compile_context>

<pallas_src>
import functools

import jax
import jax.numpy as jnp
import numpy as np
from jax.experimental import pallas as pl
from jax.experimental.pallas import tpu as pltpu


# ---------------------------------------------------------------------------
# Kernel
# ---------------------------------------------------------------------------
def _recip(x):
    """EUP approximate reciprocal + one Newton step: ~f32 accuracy, no VALU divide."""
    r = pl.reciprocal(x, approx=True)
    return r * (2.0 - x * r)


def gamma_union_kernel(alpha_ref, beta_ref, w_ref, bias_ref, out_ref, *, n):
    m, pd = alpha_ref.shape          # m = tb * n rows, pd = P*dim lanes
    L = w_ref.shape[1]               # L = 2 * pd lanes (alpha-branch | beta-branch)
    tb = m // n                      # groups (of P lane-packed unions) in this tile

    a_bf = alpha_ref[...]            # (m, pd) bf16 — fed straight to the MXU
    b_bf = beta_ref[...]

    # Packed weight slab (bf16): rows [0:pd)=layer1|alpha-in, [pd:L)=layer1|beta-in,
    # [L:2L)=layer2, [2L:3L)=layer3.  All row offsets are multiples of 16.
    w1a = w_ref[0:pd, :]
    w1b = w_ref[pd:L, :]
    w2 = w_ref[L:2 * L, :]
    w3 = w_ref[2 * L:3 * L, :]
    b1 = bias_ref[0:1, :]            # exact f32 biases
    b2 = bias_ref[1:2, :]
    b3 = bias_ref[2:3, :]

    # Three MXU layers, bf16 operands, f32 accumulation.  Splitting the layer-1
    # input into its alpha/beta halves avoids an in-kernel lane concat.
    l1 = (jnp.dot(a_bf, w1a, preferred_element_type=jnp.float32)
          + jnp.dot(b_bf, w1b, preferred_element_type=jnp.float32) + b1)
    l1 = jnp.maximum(l1, 0.0).astype(jnp.bfloat16)
    l2 = jnp.maximum(jnp.dot(l1, w2, preferred_element_type=jnp.float32) + b2, 0.0)
    l2 = l2.astype(jnp.bfloat16)
    logits = jnp.dot(l2, w3, preferred_element_type=jnp.float32) + b3      # (m, L) f32
    # TODO(synk): dropout on the logits is identity here (eval mode / p=0).

    # Per-union softmax over the n member rows (torch softmax dim=0), per column.
    # With n == 8 these reshapes are (8,128)-tile aligned (no relayout copies).
    lg = logits.reshape(tb, n, L)
    mx = jnp.max(lg, axis=1, keepdims=True)
    e = jnp.exp(lg - mx)
    attn = e * _recip(jnp.sum(e, axis=1, keepdims=True))                   # (tb, n, L)

    attn1 = attn[:, :, 0:pd]        # alpha-branch attention (lane layout == packed alpha)
    attn2 = attn[:, :, pd:L]        # beta-branch attention

    alpha = a_bf.astype(jnp.float32).reshape(tb, n, pd)
    beta = b_bf.astype(jnp.float32).reshape(tb, n, pd)

    # Gamma-union reductions (all f32, exact-precision reciprocals).
    k = alpha * attn1
    o = _recip(beta * attn2)
    t = k * o                                       # reused for both reductions
    ko_sum = jnp.sum(t, axis=1)                     # (tb, pd)   Σ k·o
    denom = jnp.sum(t * o, axis=1)                  # (tb, pd)   Σ o²·k
    k_sum = ko_sum * ko_sum * _recip(denom)
    o_sum = ko_sum * _recip(k_sum * jnp.float32(n))

    # Matches torch's  x[|x| < 1e-4] = 1e-4  (NOT torch.clamp).
    eps = jnp.float32(1e-4)
    alpha_emb = jnp.where(jnp.abs(k_sum) < eps, eps, k_sum)
    beta_emb = jnp.where(jnp.abs(o_sum) < eps, eps, o_sum)

    # Single lane-dense (tb, L) store (no narrow masked half-writes).
    out_ref[...] = jnp.concatenate([alpha_emb, beta_emb], axis=-1)


# ---------------------------------------------------------------------------
# Wrapper
# ---------------------------------------------------------------------------
def choose_lane_pack(dim, target_lanes=256):
    """How many unions to pack along the lane axis (256 lanes on v6e/v7x)."""
    return max(1, target_lanes // (2 * dim))


def gamma_union(alpha_embeddings, beta_embeddings, weight_slab, bias_slab, *,
                lane_pack, batch_tile=128, input_dtype=jnp.bfloat16):
    """alpha/beta: (B, N, dim) f32.  Returns (alpha_embedding, beta_embedding), each (B, dim)."""
    B, N, dim = alpha_embeddings.shape
    P = lane_pack
    pd = P * dim
    L = 2 * pd
    assert weight_slab.shape == (3 * L, L) and bias_slab.shape == (3, L)

    G = -(-B // P)                       # groups of P unions
    tb = max(1, min(batch_tile, G))      # clamp the tile for small batches
    Gp = -(-G // tb) * tb                # padded group count; grid = Gp // tb steps
    Bp = Gp * P
    pad = Bp - B

    def prep(x):
        if pad:
            # Pad with ones: numerically benign; padded outputs are discarded.
            x = jnp.concatenate([x, jnp.ones((pad, N, dim), x.dtype)], axis=0)
        # (Bp,N,dim) -> lane-pack P unions per group -> flatten (group,member) so the
        # kernel's matmul LHS is already 2-D (no in-kernel 3D<->2D reshape).
        x = jnp.transpose(x.reshape(Gp, P, N, dim), (0, 2, 1, 3)).reshape(Gp * N, pd)
        return x.astype(input_dtype)     # bf16 in HBM: halves input bandwidth

    a2 = prep(alpha_embeddings)
    b2 = prep(beta_embeddings)

    out = pl.pallas_call(
        functools.partial(gamma_union_kernel, n=N),
        out_shape=jax.ShapeDtypeStruct((Gp, L), jnp.float32),
        grid_spec=pltpu.PrefetchScalarGridSpec(
            num_scalar_prefetch=0,
            grid=(Gp // tb,),
            in_specs=[
                pl.BlockSpec((tb * N, pd), lambda g: (g, 0)),
                pl.BlockSpec((tb * N, pd), lambda g: (g, 0)),
                # Constant block index -> weights/biases are DMA'd once and stay resident.
                pl.BlockSpec((3 * L, L), lambda g: (0, 0)),
                pl.BlockSpec((3, L), lambda g: (0, 0)),
            ],
            out_specs=pl.BlockSpec((tb, L), lambda g: (g, 0)),
        ),
        compiler_params=pltpu.CompilerParams(
            # One independent batch axis: shards across v7x's 2 TensorCores; plain
            # pipelined loop on v5e/v6e.
            dimension_semantics=("parallel",),
        ),
    )(a2, b2, weight_slab, bias_slab)

    # Unpack: lanes [0:pd) = alpha embeddings (union p at p*dim), [pd:L) = beta.
    alpha_out = out[:, :pd].reshape(Bp, dim)[:B]
    beta_out = out[:, pd:].reshape(Bp, dim)[:B]
    return alpha_out, beta_out


# ---------------------------------------------------------------------------
# Parameter init (PyTorch-equivalent) and host-side fused / lane-packed packing
# ---------------------------------------------------------------------------
def init_params(key, dim):
    # Linear weights stored transposed as (in, out); biases as (out,).
    shapes = {
        "a1": (2 * dim, dim), "b1": (2 * dim, dim),
        "a2": (dim, dim // 2), "b2": (dim, dim // 2),
        "a3": (dim // 2, dim), "b3": (dim // 2, dim),
    }
    keys = jax.random.split(key, 2 * len(shapes))
    params = {}
    for i, (name, (fi, fo)) in enumerate(shapes.items()):
        wb = (6.0 / (fi + fo)) ** 0.5                      # xavier_uniform_
        bb = 1.0 / (fi ** 0.5)                             # nn.Linear default bias
        params[f"w{name}"] = jax.random.uniform(keys[2 * i], (fi, fo), jnp.float32, -wb, wb)
        params[f"b{name}"] = jax.random.uniform(keys[2 * i + 1], (fo,), jnp.float32, -bb, bb)
    return params


def pack_params(params, dim, lane_pack):
    """Fuse the alpha/beta branches block-diagonally, replicate for `lane_pack`
    lane-packed unions.  Returns (weight_slab (3L, L) bf16, bias_slab (3, L) f32).
    Activation lane layout: [ alpha-branch of P unions | beta-branch of P unions ]."""
    P = lane_pack
    h = dim // 2
    pd = P * dim
    L = 2 * pd
    w = np.zeros((3 * L, L), np.float32)
    b = np.zeros((3, L), np.float32)
    wa1, wb1 = np.asarray(params["wa1"]), np.asarray(params["wb1"])
    wa2, wb2 = np.asarray(params["wa2"]), np.asarray(params["wb2"])
    wa3, wb3 = np.asarray(params["wa3"]), np.asarray(params["wb3"])
    ba1, bb1 = np.asarray(params["ba1"]), np.asarray(params["bb1"])
    ba2, bb2 = np.asarray(params["ba2"]), np.asarray(params["bb2"])
    ba3, bb3 = np.asarray(params["ba3"]), np.asarray(params["bb3"])
    for p in range(P):
        ca, cb = p * dim, pd + p * dim           # dim-wide alpha / beta lane blocks
        ha, hb = p * h, P * h + p * h            # h-wide alpha / beta lane blocks (layer-2 out)
        # Layer 1 (2*dim -> dim per branch), split into alpha-input / beta-input rows.
        w[ca:ca + dim, ca:ca + dim] = wa1[:dim]
        w[ca:ca + dim, cb:cb + dim] = wb1[:dim]
        w[pd + ca:pd + ca + dim, ca:ca + dim] = wa1[dim:]
        w[pd + ca:pd + ca + dim, cb:cb + dim] = wb1[dim:]
        # Layer 2 (dim -> dim//2 per branch).
        w[L + ca:L + ca + dim, ha:ha + h] = wa2
        w[L + cb:L + cb + dim, hb:hb + h] = wb2
        # Layer 3 (dim//2 -> dim per branch).
        w[2 * L + ha:2 * L + ha + h, ca:ca + dim] = wa3
        w[2 * L + hb:2 * L + hb + h, cb:cb + dim] = wb3
        # Biases (kept exact f32).
        b[0, ca:ca + dim] = ba1
        b[0, cb:cb + dim] = bb1
        b[1, ha:ha + h] = ba2
        b[1, hb:hb + h] = bb2
        b[2, ca:ca + dim] = ba3
        b[2, cb:cb + dim] = bb3
    return jnp.asarray(w, jnp.bfloat16), jnp.asarray(b, jnp.float32)


# ---------------------------------------------------------------------------
# Pure-JAX references (mirror the PyTorch forward) for validation
# ---------------------------------------------------------------------------
def gamma_union_reference(alpha, beta, params):
    """Full-f32 mirror of the PyTorch forward (eval-mode dropout)."""
    n = alpha.shape[1]
    x = jnp.concatenate([alpha, beta], axis=-1)

    def branch(w1, b1, w2, b2, w3, b3):
        l1 = jax.nn.relu(x @ w1 + b1)
        l2 = jax.nn.relu(l1 @ w2 + b2)
        return jax.nn.softmax(l2 @ w3 + b3, axis=1)

    attn1 = branch(params["wa1"], params["ba1"], params["wa2"], params["ba2"],
                   params["wa3"], params["ba3"])
    attn2 = branch(params["wb1"], params["bb1"], params["wb2"], params["bb2"],
                   params["wb3"], params["bb3"])
    k = alpha * attn1
    o = 1.0 / (beta * attn2)
    ko = jnp.sum(k * o, axis=1)
    k_sum = ko ** 2 / jnp.sum(o * o * k, axis=1)
    o_sum = ko / (k_sum * n)
    a = jnp.where(jnp.abs(k_sum) < 1e-4, 1e-4, k_sum)
    b = jnp.where(jnp.abs(o_sum) < 1e-4, 1e-4, o_sum)
    return a, b


def gamma_union_reference_bf16(alpha, beta, params):
    """Same math, emulating the kernel's precision choices exactly: bf16 inputs,
    weights and inter-layer activations, f32 accumulation/biases/reductions."""
    bf = lambda v: jnp.asarray(v).astype(jnp.bfloat16).astype(jnp.float32)
    n = alpha.shape[1]
    a = bf(alpha)
    b = bf(beta)
    x = jnp.concatenate([a, b], axis=-1)

    def branch(w1, b1, w2, b2, w3, b3):
        l1 = bf(jax.nn.relu(x @ bf(w1) + b1))
        l2 = bf(jax.nn.relu(l1 @ bf(w2) + b2))
        return jax.nn.softmax(l2 @ bf(w3) + b3, axis=1)

    attn1 = branch(params["wa1"], params["ba1"], params["wa2"], params["ba2"],
                   params["wa3"], params["ba3"])
    attn2 = branch(params["wb1"], params["bb1"], params["wb2"], params["bb2"],
                   params["wb3"], params["bb3"])
    k = a * attn1
    o = 1.0 / (b * attn2)
    ko = jnp.sum(k * o, axis=1)
    k_sum = ko ** 2 / jnp.sum(o * o * k, axis=1)
    o_sum = ko / (k_sum * n)
    aa = jnp.where(jnp.abs(k_sum) < 1e-4, 1e-4, k_sum)
    bb = jnp.where(jnp.abs(o_sum) < 1e-4, 1e-4, o_sum)
    return aa, bb


if __name__ == "__main__":
    B, N, DIM = 16, 8, 32
    key = jax.random.PRNGKey(0)
    k_alpha, k_beta, k_params = jax.random.split(key, 3)
    # Gamma-distribution embeddings are positive (projection_regularizer upstream).
    alpha_embeddings = jax.random.uniform(k_alpha, (B, N, DIM), jnp.float32, 0.1, 2.0)
    beta_embeddings = jax.random.uniform(k_beta, (B, N, DIM), jnp.float32, 0.1, 2.0)
    params = init_params(k_params, DIM)

    P = choose_lane_pack(DIM)                       # 4 -> 256-lane activations
    w_slab, b_slab = pack_params(params, DIM, P)

    alpha_out, beta_out = gamma_union(alpha_embeddings, beta_embeddings,
                                      w_slab, b_slab, lane_pack=P, batch_tile=128)
    jax.block_until_ready((alpha_out, beta_out))
    assert alpha_out.shape == (B, DIM) and beta_out.shape == (B, DIM)

    # (1) Precision-emulated reference: validates the kernel math (incl. the gamma
    #     reductions, now on exact-precision reciprocals) at the chosen bf16 precision.
    ea, eb = gamma_union_reference_bf16(alpha_embeddings, beta_embeddings, params)
    np.testing.assert_allclose(np.asarray(alpha_out), np.asarray(ea), rtol=1e-2, atol=1e-5)
    np.testing.assert_allclose(np.asarray(beta_out), np.asarray(eb), rtol=1e-2, atol=1e-5)

    # (2) Full-f32 PyTorch-mirror reference: the remaining gap is solely the
    #     documented bf16 input/matmul precision choice (bounded by check (1)).
    ra, rb = gamma_union_reference(alpha_embeddings, beta_embeddings, params)
    np.testing.assert_allclose(np.asarray(alpha_out), np.asarray(ra), rtol=1e-1, atol=1e-4)
    np.testing.assert_allclose(np.asarray(beta_out), np.asarray(rb), rtol=1e-1, atol=1e-4)

    print("KERNEL_OK")
</pallas_src>

<mosaic_0001>
module attributes {stable_mosaic.version = 11 : i64} {
  func.func @gamma_union_kernel(%arg0: i32, %arg1: memref<32x128xbf16, #tpu.memory_space<vmem>>, %arg2: memref<32x128xbf16, #tpu.memory_space<vmem>>, %arg3: memref<768x256xbf16, #tpu.memory_space<vmem>>, %arg4: memref<3x256xf32, #tpu.memory_space<vmem>>, %arg5: memref<4x256xf32, #tpu.memory_space<vmem>>) attributes {dimension_semantics = [#tpu.dimension_semantics<parallel>], iteration_bounds = array<i64: 1>, scalar_prefetch = 0 : i64, scratch_operands = 0 : i64, tpu.core_type = #tpu.core_type<tc>, window_params = [{transform_indices = @transform_0, window_bounds = array<i64: 32, 128>}, {transform_indices = @transform_1, window_bounds = array<i64: 32, 128>}, {pipeline_mode = #tpu.pipeline_mode<synchronous>, transform_indices = @transform_2, window_bounds = array<i64: 768, 256>}, {pipeline_mode = #tpu.pipeline_mode<synchronous>, transform_indices = @transform_3, window_bounds = array<i64: 3, 256>}, {transform_indices = @transform_4, window_bounds = array<i64: 4, 256>}]} {
    %c0 = arith.constant 0 : index
    %c0_0 = arith.constant 0 : index
    %0 = vector.load %arg1[%c0, %c0_0] : memref<32x128xbf16, #tpu.memory_space<vmem>>, vector<32x128xbf16>
    %c0_1 = arith.constant 0 : index
    %c0_2 = arith.constant 0 : index
    %1 = vector.load %arg2[%c0_1, %c0_2] : memref<32x128xbf16, #tpu.memory_space<vmem>>, vector<32x128xbf16>
    %c0_3 = arith.constant 0 : index
    %c0_4 = arith.constant 0 : index
    %2 = vector.load %arg3[%c0_3, %c0_4] : memref<768x256xbf16, #tpu.memory_space<vmem>>, vector<128x256xbf16>
    %c128 = arith.constant 128 : index
    %c0_5 = arith.constant 0 : index
    %3 = vector.load %arg3[%c128, %c0_5] : memref<768x256xbf16, #tpu.memory_space<vmem>>, vector<128x256xbf16>
    %c256 = arith.constant 256 : index
    %c0_6 = arith.constant 0 : index
    %4 = vector.load %arg3[%c256, %c0_6] : memref<768x256xbf16, #tpu.memory_space<vmem>>, vector<256x256xbf16>
    %c512 = arith.constant 512 : index
    %c0_7 = arith.constant 0 : index
    %5 = vector.load %arg3[%c512, %c0_7] : memref<768x256xbf16, #tpu.memory_space<vmem>>, vector<256x256xbf16>
    %c0_8 = arith.constant 0 : index
    %c0_9 = arith.constant 0 : index
    %6 = vector.load %arg4[%c0_8, %c0_9] : memref<3x256xf32, #tpu.memory_space<vmem>>, vector<1x256xf32>
    %c1 = arith.constant 1 : index
    %c0_10 = arith.constant 0 : index
    %7 = vector.load %arg4[%c1, %c0_10] : memref<3x256xf32, #tpu.memory_space<vmem>>, vector<1x256xf32>
    %c2 = arith.constant 2 : index
    %c0_11 = arith.constant 0 : index
    %8 = vector.load %arg4[%c2, %c0_11] : memref<3x256xf32, #tpu.memory_space<vmem>>, vector<1x256xf32>
    %cst = arith.constant dense<0.000000e+00> : vector<32x256xf32>
    %9 = tpu.matmul %0, %2, %cst {dimension_numbers = #tpu.dot_dimension_numbers<[1], [0], [0], [1], [0, 0, 1, 1], [], []>} : vector<32x128xbf16>, vector<128x256xbf16>, vector<32x256xf32> -> vector<32x256xf32>
    %cst_12 = arith.constant dense<0.000000e+00> : vector<32x256xf32>
    %10 = tpu.matmul %1, %3, %cst_12 {dimension_numbers = #tpu.dot_dimension_numbers<[1], [0], [0], [1], [0, 0, 1, 1], [], []>} : vector<32x128xbf16>, vector<128x256xbf16>, vector<32x256xf32> -> vector<32x256xf32>
    %11 = arith.addf %9, %10 : vector<32x256xf32>
    %12 = vector.broadcast %6 : vector<1x256xf32> to vector<32x256xf32>
    %13 = arith.addf %11, %12 : vector<32x256xf32>
    %cst_13 = arith.constant 0.000000e+00 : f32
    %14 = vector.broadcast %cst_13 : f32 to vector<32x256xf32>
    %15 = arith.maximumf %13, %14 : vector<32x256xf32>
    %16 = arith.truncf %15 : vector<32x256xf32> to vector<32x256xbf16>
    %cst_14 = arith.constant dense<0.000000e+00> : vector<32x256xf32>
    %17 = tpu.matmul %16, %4, %cst_14 {dimension_numbers = #tpu.dot_dimension_numbers<[1], [0], [0], [1], [0, 0, 1, 1], [], []>} : vector<32x256xbf16>, vector<256x256xbf16>, vector<32x256xf32> -> vector<32x256xf32>
    %18 = vector.broadcast %7 : vector<1x256xf32> to vector<32x256xf32>
    %19 = arith.addf %17, %18 : vector<32x256xf32>
    %cst_15 = arith.constant 0.000000e+00 : f32
    %20 = vector.broadcast %cst_15 : f32 to vector<32x256xf32>
    %21 = arith.maximumf %19, %20 : vector<32x256xf32>
    %22 = arith.truncf %21 : vector<32x256xf32> to vector<32x256xbf16>
    %cst_16 = arith.constant dense<0.000000e+00> : vector<32x256xf32>
    %23 = tpu.matmul %22, %5, %cst_16 {dimension_numbers = #tpu.dot_dimension_numbers<[1], [0], [0], [1], [0, 0, 1, 1], [], []>} : vector<32x256xbf16>, vector<256x256xbf16>, vector<32x256xf32> -> vector<32x256xf32>
    %24 = vector.broadcast %8 : vector<1x256xf32> to vector<32x256xf32>
    %25 = arith.addf %23, %24 : vector<32x256xf32>
    %26 = vector.shape_cast %25 : vector<32x256xf32> to vector<4x8x256xf32>
    %cst_17 = arith.constant dense<0xFF800000> : vector<4x256xf32>
    %27 = vector.multi_reduction <maximumf>, %26, %cst_17 [1] : vector<4x8x256xf32> to vector<4x256xf32>
    %28 = vector.shape_cast %27 : vector<4x256xf32> to vector<4x1x256xf32>
    %29 = vector.broadcast %28 : vector<4x1x256xf32> to vector<4x8x256xf32>
    %30 = arith.subf %26, %29 : vector<4x8x256xf32>
    %31 = math.exp %30 : vector<4x8x256xf32>
    %cst_18 = arith.constant dense<0.000000e+00> : vector<4x256xf32>
    %32 = vector.multi_reduction <add>, %31, %cst_18 [1] : vector<4x8x256xf32> to vector<4x256xf32>
    %33 = vector.shape_cast %32 : vector<4x256xf32> to vector<4x1x256xf32>
    %34 = tpu.reciprocal %33 {approx = true} : vector<4x1x256xf32> -> vector<4x1x256xf32>
    %35 = arith.mulf %33, %34 : vector<4x1x256xf32>
    %cst_19 = arith.constant 2.000000e+00 : f32
    %36 = vector.broadcast %cst_19 : f32 to vector<4x1x256xf32>
    %37 = arith.subf %36, %35 : vector<4x1x256xf32>
    %38 = arith.mulf %34, %37 : vector<4x1x256xf32>
    %39 = vector.broadcast %38 : vector<4x1x256xf32> to vector<4x8x256xf32>
    %40 = arith.mulf %31, %39 : vector<4x8x256xf32>
    %41 = vector.extract_strided_slice %40 {offsets = [0, 0, 0], sizes = [4, 8, 128], strides = [1, 1, 1]} : vector<4x8x256xf32> to vector<4x8x128xf32>
    %42 = vector.extract_strided_slice %40 {offsets = [0, 0, 128], sizes = [4, 8, 128], strides = [1, 1, 1]} : vector<4x8x256xf32> to vector<4x8x128xf32>
    %43 = arith.extf %0 : vector<32x128xbf16> to vector<32x128xf32>
    %44 = vector.shape_cast %43 : vector<32x128xf32> to vector<4x8x128xf32>
    %45 = arith.extf %1 : vector<32x128xbf16> to vector<32x128xf32>
    %46 = vector.shape_cast %45 : vector<32x128xf32> to vector<4x8x128xf32>
    %47 = arith.mulf %44, %41 : vector<4x8x128xf32>
    %48 = arith.mulf %46, %42 : vector<4x8x128xf32>
    %49 = tpu.reciprocal %48 {approx = true} : vector<4x8x128xf32> -> vector<4x8x128xf32>
    %50 = arith.mulf %48, %49 : vector<4x8x128xf32>
    %cst_20 = arith.constant 2.000000e+00 : f32
    %51 = vector.broadcast %cst_20 : f32 to vector<4x8x128xf32>
    %52 = arith.subf %51, %50 : vector<4x8x128xf32>
    %53 = arith.mulf %49, %52 : vector<4x8x128xf32>
    %54 = arith.mulf %47, %53 : vector<4x8x128xf32>
    %cst_21 = arith.constant dense<0.000000e+00> : vector<4x128xf32>
    %55 = vector.multi_reduction <add>, %54, %cst_21 [1] : vector<4x8x128xf32> to vector<4x128xf32>
    %56 = arith.mulf %54, %53 : vector<4x8x128xf32>
    %cst_22 = arith.constant dense<0.000000e+00> : vector<4x128xf32>
    %57 = vector.multi_reduction <add>, %56, %cst_22 [1] : vector<4x8x128xf32> to vector<4x128xf32>
    %58 = arith.mulf %55, %55 : vector<4x128xf32>
    %59 = tpu.reciprocal %57 {approx = true} : vector<4x128xf32> -> vector<4x128xf32>
    %60 = arith.mulf %57, %59 : vector<4x128xf32>
    %cst_23 = arith.constant 2.000000e+00 : f32
    %61 = vector.broadcast %cst_23 : f32 to vector<4x128xf32>
    %62 = arith.subf %61, %60 : vector<4x128xf32>
    %63 = arith.mulf %59, %62 : vector<4x128xf32>
    %64 = arith.mulf %58, %63 : vector<4x128xf32>
    %cst_24 = arith.constant 8.000000e+00 : f32
    %65 = vector.broadcast %cst_24 : f32 to vector<4x128xf32>
    %66 = arith.mulf %64, %65 : vector<4x128xf32>
    %67 = tpu.reciprocal %66 {approx = true} : vector<4x128xf32> -> vector<4x128xf32>
    %68 = arith.mulf %66, %67 : vector<4x128xf32>
    %cst_25 = arith.constant 2.000000e+00 : f32
    %69 = vector.broadcast %cst_25 : f32 to vector<4x128xf32>
    %70 = arith.subf %69, %68 : vector<4x128xf32>
    %71 = arith.mulf %67, %70 : vector<4x128xf32>
    %72 = arith.mulf %55, %71 : vector<4x128xf32>
    %73 = math.absf %64 : vector<4x128xf32>
    %cst_26 = arith.constant 9.99999974E-5 : f32
    %74 = vector.broadcast %cst_26 : f32 to vector<4x128xf32>
    %75 = arith.cmpf olt, %73, %74 : vector<4x128xf32>
    %cst_27 = arith.constant 9.99999974E-5 : f32
    %76 = vector.broadcast %cst_27 : f32 to vector<4x128xf32>
    %77 = arith.select %75, %76, %64 : vector<4x128xi1>, vector<4x128xf32>
    %78 = math.absf %72 : vector<4x128xf32>
    %cst_28 = arith.constant 9.99999974E-5 : f32
    %79 = vector.broadcast %cst_28 : f32 to vector<4x128xf32>
    %80 = arith.cmpf olt, %78, %79 : vector<4x128xf32>
    %cst_29 = arith.constant 9.99999974E-5 : f32
    %81 = vector.broadcast %cst_29 : f32 to vector<4x128xf32>
    %82 = arith.select %80, %81, %72 : vector<4x128xi1>, vector<4x128xf32>
    %83 = tpu.concatenate %77, %82 in 1 : vector<4x128xf32>, vector<4x128xf32> -> vector<4x256xf32>
    %c0_30 = arith.constant 0 : index
    %c0_31 = arith.constant 0 : index
    %84 = vector.load %arg5[%c0_30, %c0_31] : memref<4x256xf32, #tpu.memory_space<vmem>>, vector<4x256xf32>
    tpu.vector_store %arg5[%c0_30, %c0_31], %83 {strides = array<i32>} : memref<4x256xf32, #tpu.memory_space<vmem>>, vector<4x256xf32>,
    return
  }
  func.func @transform_0(%arg0: i32) -> (i32, i32) {
    %c0_i32 = arith.constant 0 : i32
    %c0_i32_0 = arith.constant 0 : i32
    return %arg0, %c0_i32 : i32, i32
  }
  func.func @transform_1(%arg0: i32) -> (i32, i32) {
    %c0_i32 = arith.constant 0 : i32
    %c0_i32_0 = arith.constant 0 : i32
    return %arg0, %c0_i32 : i32, i32
  }
  func.func @transform_2(%arg0: i32) -> (i32, i32) {
    %c0_i32 = arith.constant 0 : i32
    %c0_i32_0 = arith.constant 0 : i32
    %c0_i32_1 = arith.constant 0 : i32
    return %c0_i32, %c0_i32_0 : i32, i32
  }
  func.func @transform_3(%arg0: i32) -> (i32, i32) {
    %c0_i32 = arith.constant 0 : i32
    %c0_i32_0 = arith.constant 0 : i32
    %c0_i32_1 = arith.constant 0 : i32
    return %c0_i32, %c0_i32_0 : i32, i32
  }
  func.func @transform_4(%arg0: i32) -> (i32, i32) {
    %c0_i32 = arith.constant 0 : i32
    %c0_i32_0 = arith.constant 0 : i32
    return %arg0, %c0_i32 : i32, i32
  }
}

</mosaic_0001>

<bundles_post_ra>
// kernel: tpu_custom_call.1
= control target key start
LH: loop header
LB: loop body
LE: loop exit
PB: predicated region body
PF: predicated region fallthrough
CT: control target
= control target key end

     0   :  { %9 = vsyncpa [#allocation3], 0  ;;  %s1920_s0 = inlined_call_operand.hbm [shape: bf16[32,128], index: 0, kind: input, shape index: {}]   ;;  %s1921_s1 = inlined_call_operand.hbm [shape: bf16[32,128], index: 1, kind: input, shape index: {}]   ;;  %s1922_s2 = inlined_call_operand.hbm [shape: bf16[768,256], index: 2, kind: input, shape index: {}]   ;;  %s1923_s3 = inlined_call_operand.vmem [shape: f32[3,256], index: 3, kind: input, shape index: {}]   ;;  %s1924_s4 = inlined_call_operand.hbm [shape: f32[4,256], index: 4, kind: output, shape index: {}]  }
   0x1   :  { %10 = vsyncpa [#allocation6], 0 }
   0x2   :  { %11 = vsyncpa [#allocation4], 0  ;;  %s1727_s15 = smov [#allocation5]   ;;  %s1728_s17 = smov [#allocation2]  }
   0x3   :  { %s29_s16 = sshll.u32 %s1727_s15, 4  ;;  %s17_s18 = sshll.u32 %s1728_s17, 4  ;;  %s30_s16 = int_to_ptr.vmem [resolvable:$true] %s29_s16  ;;  %s1761_s18 = int_to_ptr.vmem [resolvable:$true] %s17_s18 }
   0x4   :  { %s1633_s21 = scalar_lea.hbm %s1921_s1, 256 }
   0x5   :  { %p1634_p0 = scmp.ne.s32.totalorder %s1921_s1, %s1633_s21  ;;  %p1637_p1 = scmp.lt.u32.totalorder %s1633_s21, %s1921_s1 }
   0x7   :  { %p1639_p2 = pnand %p1637_p1, %p1634_p0 }
   0x9   :  { %1642 = shalt.err (!%p1639_p2)
}
   0xa   :  { %s1643_s26 = scalar_lea.vmem %s30_s16, 256  ;;  %p1648_p4 = scmp.lt.s32.totalorder %s30_s16, %s30_s16 }
   0xb   :  { %p1644_p3 = scmp.ne.s32.totalorder %s30_s16, %s1643_s26  ;;  %p1649_p5 = scmp.lt.s32.totalorder %s1643_s26, %s1643_s26 }
   0xd   :  { %p1650_p6 = por %p1649_p5, %p1648_p4 }
   0xf   :  { %p1651_p7 = pnand %p1650_p6, %p1644_p3 }
  0x11   :  { %1654 = shalt.err (!%p1651_p7)
}
  0x12   :  { %s1729_s27 = smov 64   ;;  %s1730_s28 = smov 4  }
  0x13   :  { %35 = dma.hbm_to_vmem [thread:$0]  %s1921_s1, 256, %s30_s16, [#allocation6], %s1729_s27, %s1729_s27, %s1730_s28  }
  0x14   :  { %s1655_s7 = scalar_lea.hbm %s1920_s0, 256 }
  0x15   :  { %p1656_p8 = scmp.ne.s32.totalorder %s1920_s0, %s1655_s7  ;;  %p1659_p9 = scmp.lt.u32.totalorder %s1655_s7, %s1920_s0 }
  0x17   :  { %p1661_p10 = pnand %p1659_p9, %p1656_p8 }
  0x19   :  { %1664 = shalt.err (!%p1661_p10)
}
  0x1a   :  { %s1665_s12 = scalar_lea.vmem %s1761_s18, 256  ;;  %p1670_p12 = scmp.lt.s32.totalorder %s1761_s18, %s1761_s18 }
  0x1b   :  { %p1666_p11 = scmp.ne.s32.totalorder %s1761_s18, %s1665_s12  ;;  %p1671_p13 = scmp.lt.s32.totalorder %s1665_s12, %s1665_s12 }
  0x1d   :  { %p1672_p0 = por %p1671_p13, %p1670_p12 }
  0x1f   :  { %p1673_p1 = pnand %p1672_p0, %p1666_p11 }
  0x21   :  { %1676 = shalt.err (!%p1673_p1)
}
  0x22   :  { %23 = dma.hbm_to_vmem [thread:$0]  %s1920_s0, 256, %s1761_s18, [#allocation3], %s1729_s27, %s1729_s27, %s1730_s28  }
  0x23   :  { %s1731_s14 = smov [#allocation7]   ;;  %s1677_s19 = scalar_lea.hbm %s1922_s2, 12288 }
  0x24   :  { %s41_s15 = sshll.u32 %s1731_s14, 4  ;;  %p1678_p2 = scmp.ne.s32.totalorder %s1922_s2, %s1677_s19  ;;  %s42_s15 = int_to_ptr.vmem [resolvable:$true] %s41_s15 }
  0x25   :  { %p1681_p3 = scmp.lt.u32.totalorder %s1677_s19, %s1922_s2 }
  0x27   :  { %p1683_p4 = pnand %p1681_p3, %p1678_p2 }
  0x29   :  { %1686 = shalt.err (!%p1683_p4)
}
  0x2a   :  { %s1687_s24 = scalar_lea.vmem %s42_s15, 12288  ;;  %p1692_p6 = scmp.lt.s32.totalorder %s42_s15, %s42_s15 }
  0x2b   :  { %p1688_p5 = scmp.ne.s32.totalorder %s42_s15, %s1687_s24  ;;  %p1693_p7 = scmp.lt.s32.totalorder %s1687_s24, %s1687_s24 }
  0x2d   :  { %p1694_p8 = por %p1693_p7, %p1692_p6 }
  0x2f   :  { %p1695_p9 = pnand %p1694_p8, %p1688_p5 }
  0x31   :  { %1698 = shalt.err (!%p1695_p9)
}
  0x32   :  { %s1732_s0 = smov 128   ;;  %s1733_s18 = smov 8  }
  0x33   :  { %47 = dma.hbm_to_vmem [thread:$0]  %s1922_s2, 12288, %s42_s15, [#allocation6], %s1732_s0, %s1732_s0, %s1733_s18  }
  0x34   :  { %1721 = dma.done.wait [#allocation3], 256  }
  0x35   :  { %1722 = vsyncadd [#allocation3], 4294967040 }
  0x36   :  { %1723 = dma.done.wait [#allocation6], 12544  }
  0x37   :  { %1724 = vsyncadd [#allocation6], 4294954752  ;;  %v1734_v0 = vmov 0   ;;  %v1425_v1 = vld [vmem:[#allocation7 + $0x84] ss:$8 sps:$4 sm:$0xff]   ;;  %v1806_v33 = vld [vmem:[#allocation5] sm:$0xff]  }
  0x38   :  { %293 = vmatprep.mubr.bf16.mxu1 %v1734_v0  ;;  %438 = vmatprep.mubr.bf16.mxu0 %v1734_v0  ;;  %v1427_v2 = vld [vmem:[#allocation7 + $0x4] ss:$8 sps:$4 sm:$0xff]   ;;  %v1429_v3 = vld [vmem:[#allocation7 + $0x80] ss:$8 sps:$4 sm:$0xff]   ;;  %v1431_v5 = vld [vmem:[#allocation7 + $0x94] ss:$8 sps:$4 sm:$0xff]  }
  0x39   :  { %261 = vmatprep.subr.bf16.mxu1 %v1425_v1  ;;  %v1430_v4 = vld [vmem:[#allocation7] ss:$8 sps:$4 sm:$0xff]   ;;  %406 = vmatprep.subr.bf16.mxu0 %v1427_v2  ;;  %v1433_v6 = vld [vmem:[#allocation7 + $0x14] ss:$8 sps:$4 sm:$0xff]   ;;  %v1435_v7 = vld [vmem:[#allocation7 + $0x90] ss:$8 sps:$4 sm:$0xff]  }
  0x3a   :  { %262 = vmatpush1.bf16.msra.mxu1 %v1429_v3  ;;  %407 = vmatpush1.bf16.msra.mxu0 %v1430_v4  ;;  %v1436_v8 = vld [vmem:[#allocation7 + $0x10] ss:$8 sps:$4 sm:$0xff]   ;;  %v1437_v9 = vld [vmem:[#allocation7 + $0xa4] ss:$8 sps:$4 sm:$0xff]   ;;  %v1441_v11 = vld [vmem:[#allocation7 + $0xa0] ss:$8 sps:$4 sm:$0xff]  }
  0x3b   :  { %263 = vmatprep.subr.bf16.mxu1 %v1431_v5  ;;  %408 = vmatprep.subr.bf16.mxu0 %v1433_v6  ;;  %v1439_v10 = vld [vmem:[#allocation7 + $0x24] ss:$8 sps:$4 sm:$0xff]   ;;  %v1442_v12 = vld [vmem:[#allocation7 + $0x20] ss:$8 sps:$4 sm:$0xff]   ;;  %v1443_v13 = vld [vmem:[#allocation7 + $0xb4] ss:$8 sps:$4 sm:$0xff]  }
  0x3c   :  { %v1445_v14 = vld [vmem:[#allocation7 + $0x34] ss:$8 sps:$4 sm:$0xff]   ;;  %v1447_v15 = vld [vmem:[#allocation7 + $0xb0] ss:$8 sps:$4 sm:$0xff]   ;;  %v1449_v17 = vld [vmem:[#allocation7 + $0xc4] ss:$8 sps:$4 sm:$0xff]  }
  0x3d   :  { %v1448_v16 = vld [vmem:[#allocation7 + $0x30] ss:$8 sps:$4 sm:$0xff]   ;;  %v1451_v18 = vld [vmem:[#allocation7 + $0x44] ss:$8 sps:$4 sm:$0xff]   ;;  %v1453_v19 = vld [vmem:[#allocation7 + $0xc0] ss:$8 sps:$4 sm:$0xff]  }
  0x3e   :  { %264 = vmatpush1.bf16.msra.mxu1 %v1435_v7  ;;  %409 = vmatpush1.bf16.msra.mxu0 %v1436_v8  ;;  %v1454_v20 = vld [vmem:[#allocation7 + $0x40] ss:$8 sps:$4 sm:$0xff]   ;;  %v1455_v21 = vld [vmem:[#allocation7 + $0xd4] ss:$8 sps:$4 sm:$0xff]   ;;  %v1459_v23 = vld [vmem:[#allocation7 + $0xd0] ss:$8 sps:$4 sm:$0xff]  }
  0x3f   :  { %265 = vmatprep.subr.bf16.mxu1 %v1437_v9  ;;  %410 = vmatprep.subr.bf16.mxu0 %v1439_v10  ;;  %v1457_v22 = vld [vmem:[#allocation7 + $0x54] ss:$8 sps:$4 sm:$0xff]   ;;  %v1460_v24 = vld [vmem:[#allocation7 + $0x50] ss:$8 sps:$4 sm:$0xff]   ;;  %v1461_v25 = vld [vmem:[#allocation7 + $0xe4] ss:$8 sps:$4 sm:$0xff]  }
  0x40   :  { %v1463_v26 = vld [vmem:[#allocation7 + $0x64] ss:$8 sps:$4 sm:$0xff]   ;;  %v1465_v27 = vld [vmem:[#allocation7 + $0xe0] ss:$8 sps:$4 sm:$0xff]   ;;  %v1467_v29 = vld [vmem:[#allocation7 + $0xf4] ss:$8 sps:$4 sm:$0xff]  }
  0x41   :  { %v1466_v28 = vld [vmem:[#allocation7 + $0x60] ss:$8 sps:$4 sm:$0xff]   ;;  %v1469_v30 = vld [vmem:[#allocation7 + $0x74] ss:$8 sps:$4 sm:$0xff]   ;;  %v1471_v31 = vld [vmem:[#allocation7 + $0xf0] ss:$8 sps:$4 sm:$0xff]  }
  0x42   :  { %266 = vmatpush1.bf16.msra.mxu1 %v1441_v11  ;;  %411 = vmatpush1.bf16.msra.mxu0 %v1442_v12  ;;  %v1472_v32 = vld [vmem:[#allocation7 + $0x70] ss:$8 sps:$4 sm:$0xff]   ;;  %v1808_v34 = vld [vmem:[#allocation2] sm:$0xff]   ;;  %v1482_v37 = vld [vmem:[#allocation7 + $0x114] ss:$8 sps:$4 sm:$0xff]   ;;  %vm1274_vm1 = vcmask 1041409  }
  0x43   :  { %267 = vmatprep.subr.bf16.mxu1 %v1443_v13  ;;  %412 = vmatprep.subr.bf16.mxu0 %v1445_v14  ;;  %v1479_v35 = vld [vmem:[#allocation7 + $0x104] ss:$8 sps:$4 sm:$0xff]   ;;  %v1477_v36 = vld [vmem:[#allocation7 + $0x100] ss:$8 sps:$4 sm:$0xff]   ;;  %v1812_v38 = vld [vmem:[#allocation5 + $0x8] sm:$0xff]   ;;  %vm1276_vm3 = vcmask 1042434  }
  0x44   :  { %v1816_v39 = vld [vmem:[#allocation2 + $0x8] sm:$0xff]   ;;  %v1480_v40 = vld [vmem:[#allocation7 + $0x110] ss:$8 sps:$4 sm:$0xff]   ;;  %v1488_v43 = vld [vmem:[#allocation7 + $0x134] ss:$8 sps:$4 sm:$0xff]   ;;  %vm1278_vm5 = vcmask 1043459  }
  0x45   :  { %v1485_v41 = vld [vmem:[#allocation7 + $0x124] ss:$8 sps:$4 sm:$0xff]   ;;  %v1483_v42 = vld [vmem:[#allocation7 + $0x120] ss:$8 sps:$4 sm:$0xff]   ;;  %v1486_v44 = vld [vmem:[#allocation7 + $0x130] ss:$8 sps:$4 sm:$0xff]  }
  0x46   :  { %268 = vmatpush1.bf16.msra.mxu1 %v1447_v15  ;;  %413 = vmatpush1.bf16.msra.mxu0 %v1448_v16  ;;  %v1491_v45 = vld [vmem:[#allocation7 + $0x144] ss:$8 sps:$4 sm:$0xff]   ;;  %v1489_v46 = vld [vmem:[#allocation7 + $0x140] ss:$8 sps:$4 sm:$0xff]   ;;  %v1494_v47 = vld [vmem:[#allocation7 + $0x154] ss:$8 sps:$4 sm:$0xff]  }
  0x47   :  { %269 = vmatprep.subr.bf16.mxu1 %v1449_v17  ;;  %414 = vmatprep.subr.bf16.mxu0 %v1451_v18  ;;  %v1492_v48 = vld [vmem:[#allocation7 + $0x150] ss:$8 sps:$4 sm:$0xff]   ;;  %v1497_v49 = vld [vmem:[#allocation7 + $0x164] ss:$8 sps:$4 sm:$0xff]   ;;  %v1495_v50 = vld [vmem:[#allocation7 + $0x160] ss:$8 sps:$4 sm:$0xff]  }
  0x48   :  { %v1500_v51 = vld [vmem:[#allocation7 + $0x174] ss:$8 sps:$4 sm:$0xff]   ;;  %v1498_v52 = vld [vmem:[#allocation7 + $0x170] ss:$8 sps:$4 sm:$0xff]   ;;  %v1503_v53 = vld [vmem:[#allocation7 + $0x184] ss:$8 sps:$4 sm:$0xff]  }
  0x49   :  { %v1501_v54 = vld [vmem:[#allocation7 + $0x180] ss:$8 sps:$4 sm:$0xff]   ;;  %v1506_v55 = vld [vmem:[#allocation7 + $0x194] ss:$8 sps:$4 sm:$0xff]   ;;  %v1504_v56 = vld [vmem:[#allocation7 + $0x190] ss:$8 sps:$4 sm:$0xff]  }
  0x4a   :  { %270 = vmatpush1.bf16.msra.mxu1 %v1453_v19  ;;  %415 = vmatpush1.bf16.msra.mxu0 %v1454_v20  ;;  %v1509_v57 = vld [vmem:[#allocation7 + $0x1a4] ss:$8 sps:$4 sm:$0xff]   ;;  %v1507_v58 = vld [vmem:[#allocation7 + $0x1a0] ss:$8 sps:$4 sm:$0xff]   ;;  %v1512_v59 = vld [vmem:[#allocation7 + $0x1b4] ss:$8 sps:$4 sm:$0xff]  }
  0x4b   :  { %271 = vmatprep.subr.bf16.mxu1 %v1455_v21  ;;  %416 = vmatprep.subr.bf16.mxu0 %v1457_v22  ;;  %v1510_v60 = vld [vmem:[#allocation7 + $0x1b0] ss:$8 sps:$4 sm:$0xff]   ;;  %v1515_v61 = vld [vmem:[#allocation7 + $0x1c4] ss:$8 sps:$4 sm:$0xff]   ;;  %v1513_v62 = vld [vmem:[#allocation7 + $0x1c0] ss:$8 sps:$4 sm:$0xff]  }
  0x4c   :  { %v1518_v63 = vld [vmem:[#allocation7 + $0x1d4] ss:$8 sps:$4 sm:$0xff]   ;;  %v1521_v1 = vld [vmem:[#allocation7 + $0x1e4] ss:$8 sps:$4 sm:$0xff]   ;;  %v1519_v2 = vld [vmem:[#allocation7 + $0x1e0] ss:$8 sps:$4 sm:$0xff]  }
  0x4d   :  { %v1524_v3 = vld [vmem:[#allocation7 + $0x1f4] ss:$8 sps:$4 sm:$0xff]   ;;  %v1522_v4 = vld [vmem:[#allocation7 + $0x1f0] ss:$8 sps:$4 sm:$0xff]   ;;  %v1525_v5 = vld [vmem:[#allocation7 + $0x200] ss:$8 sps:$4 sm:$0xff]  }
  0x4e   :  { %272 = vmatpush1.bf16.msra.mxu1 %v1459_v23  ;;  %417 = vmatpush1.bf16.msra.mxu0 %v1460_v24  ;;  %v1527_v6 = vld [vmem:[#allocation7 + $0x204] ss:$8 sps:$4 sm:$0xff]   ;;  %v1530_v7 = vld [vmem:[#allocation7 + $0x214] ss:$8 sps:$4 sm:$0xff]   ;;  %v1528_v8 = vld [vmem:[#allocation7 + $0x210] ss:$8 sps:$4 sm:$0xff]  }
  0x4f   :  { %273 = vmatprep.subr.bf16.mxu1 %v1461_v25  ;;  %418 = vmatprep.subr.bf16.mxu0 %v1463_v26  ;;  %v1533_v9 = vld [vmem:[#allocation7 + $0x224] ss:$8 sps:$4 sm:$0xff]   ;;  %v1531_v10 = vld [vmem:[#allocation7 + $0x220] ss:$8 sps:$4 sm:$0xff]   ;;  %v1536_v11 = vld [vmem:[#allocation7 + $0x234] ss:$8 sps:$4 sm:$0xff]  }
  0x50   :  { %v1534_v12 = vld [vmem:[#allocation7 + $0x230] ss:$8 sps:$4 sm:$0xff]   ;;  %v1539_v13 = vld [vmem:[#allocation7 + $0x244] ss:$8 sps:$4 sm:$0xff]   ;;  %v1537_v14 = vld [vmem:[#allocation7 + $0x240] ss:$8 sps:$4 sm:$0xff]  }
  0x51   :  { %v1542_v15 = vld [vmem:[#allocation7 + $0x254] ss:$8 sps:$4 sm:$0xff]   ;;  %v1540_v16 = vld [vmem:[#allocation7 + $0x250] ss:$8 sps:$4 sm:$0xff]   ;;  %v1545_v17 = vld [vmem:[#allocation7 + $0x264] ss:$8 sps:$4 sm:$0xff]  }
  0x52   :  { %274 = vmatpush1.bf16.msra.mxu1 %v1465_v27  ;;  %419 = vmatpush1.bf16.msra.mxu0 %v1466_v28  ;;  %v1543_v18 = vld [vmem:[#allocation7 + $0x260] ss:$8 sps:$4 sm:$0xff]   ;;  %v1548_v19 = vld [vmem:[#allocation7 + $0x274] ss:$8 sps:$4 sm:$0xff]   ;;  %v1546_v20 = vld [vmem:[#allocation7 + $0x270] ss:$8 sps:$4 sm:$0xff]  }
  0x53   :  { %275 = vmatprep.subr.bf16.mxu1 %v1467_v29  ;;  %420 = vmatprep.subr.bf16.mxu0 %v1469_v30  ;;  %v1551_v21 = vld [vmem:[#allocation7 + $0x284] ss:$8 sps:$4 sm:$0xff]   ;;  %v1549_v22 = vld [vmem:[#allocation7 + $0x280] ss:$8 sps:$4 sm:$0xff]   ;;  %v1554_v23 = vld [vmem:[#allocation7 + $0x294] ss:$8 sps:$4 sm:$0xff]  }
  0x54   :  { %v1552_v24 = vld [vmem:[#allocation7 + $0x290] ss:$8 sps:$4 sm:$0xff]   ;;  %v1557_v25 = vld [vmem:[#allocation7 + $0x2a4] ss:$8 sps:$4 sm:$0xff]   ;;  %v1555_v26 = vld [vmem:[#allocation7 + $0x2a0] ss:$8 sps:$4 sm:$0xff]  }
  0x55   :  { %v1560_v27 = vld [vmem:[#allocation7 + $0x2b4] ss:$8 sps:$4 sm:$0xff]   ;;  %v1558_v28 = vld [vmem:[#allocation7 + $0x2b0] ss:$8 sps:$4 sm:$0xff]   ;;  %v1563_v29 = vld [vmem:[#allocation7 + $0x2c4] ss:$8 sps:$4 sm:$0xff]  }
  0x56   :  { %276 = vmatpush1.bf16.msra.mxu1 %v1471_v31  ;;  %421 = vmatpush1.bf16.msra.mxu0 %v1472_v32  ;;  %v1561_v30 = vld [vmem:[#allocation7 + $0x2c0] ss:$8 sps:$4 sm:$0xff]   ;;  %v1566_v31 = vld [vmem:[#allocation7 + $0x2d4] ss:$8 sps:$4 sm:$0xff]   ;;  %v1564_v32 = vld [vmem:[#allocation7 + $0x2d0] ss:$8 sps:$4 sm:$0xff]  }
  0x57   :  { %661 = vmatprep.subr.bf16.mxu1 %v1479_v35  ;;  %897 = vmatprep.subr.bf16.mxu0 %v1527_v6  ;;  %v460_v35 = vlaneseq }
  0x59   :  { %294 = vmatmul.mubr.bf16.vlgmr.msra.gmra.mrb[0].mxu1 %v1806_v33  ;;  %439 = vmatmul.mubr.bf16.vlgmr.msra.gmra.mrb[0].mxu0 %v1808_v34 }
  0x5a   :  { %303 = vmatprep.mubr.bf16.mxu1 %v1734_v0  ;;  %448 = vmatprep.mubr.bf16.mxu0 %v1734_v0  ;;  %v1516_v0 = vld [vmem:[#allocation7 + $0x1d0] ss:$8 sps:$4 sm:$0xff]  }
  0x5b   :  { %662 = vmatpush1.bf16.msra.mxu1 %v1477_v36  ;;  %898 = vmatpush1.bf16.msra.mxu0 %v1525_v5  ;;  %v461_v36 = vshrl.u32 %v460_v35, 7 }
  0x5c   :  { %663 = vmatprep.subr.bf16.mxu1 %v1482_v37  ;;  %899 = vmatprep.subr.bf16.mxu0 %v1530_v7 }
  0x5d   :  { %v1820_v37 = vsub.s32 0, %v461_v36 }
  0x5f   :  { %664 = vmatpush1.bf16.msra.mxu1 %v1480_v40  ;;  %900 = vmatpush1.bf16.msra.mxu0 %v1528_v8  ;;  %v164_v40 = vld [vmem:[%s1923_s3] ss:$4 sm:$0x3] }
  0x60   :  { %665 = vmatprep.subr.bf16.mxu1 %v1485_v41  ;;  %901 = vmatprep.subr.bf16.mxu0 %v1533_v9  ;;  %v1825_v41 = vsub.s32 1, %v461_v36 }
  0x61   :  { %304 = vmatmul.mubr.bf16.gmra.mrb[4].mxu1 %v1812_v38  ;;  %449 = vmatmul.mubr.bf16.gmra.mrb[4].mxu0 %v1816_v39 }
  0x63   :  { %666 = vmatpush1.bf16.msra.mxu1 %v1483_v42  ;;  %902 = vmatpush1.bf16.msra.mxu0 %v1531_v10  ;;  %v463_v42 = vrot.slane %v164_v40, %v1820_v37 }
  0x64   :  { %667 = vmatprep.subr.bf16.mxu1 %v1488_v43  ;;  %903 = vmatprep.subr.bf16.mxu0 %v1536_v11 }
  0x67   :  { %668 = vmatpush1.bf16.msra.mxu1 %v1486_v44  ;;  %904 = vmatpush1.bf16.msra.mxu0 %v1534_v12 }
  0x68   :  { %669 = vmatprep.subr.bf16.mxu1 %v1491_v45  ;;  %905 = vmatprep.subr.bf16.mxu0 %v1539_v13  ;;  %v467_v45 = vrot.slane %v164_v40, %v1825_v41 }
  0x6b   :  { %670 = vmatpush1.bf16.msra.mxu1 %v1489_v46  ;;  %906 = vmatpush1.bf16.msra.mxu0 %v1537_v14 }
  0x6c   :  { %671 = vmatprep.subr.bf16.mxu1 %v1494_v47  ;;  %907 = vmatprep.subr.bf16.mxu0 %v1542_v15 }
  0x6f   :  { %672 = vmatpush1.bf16.msra.mxu1 %v1492_v48  ;;  %908 = vmatpush1.bf16.msra.mxu0 %v1540_v16 }
  0x70   :  { %673 = vmatprep.subr.bf16.mxu1 %v1497_v49  ;;  %909 = vmatprep.subr.bf16.mxu0 %v1545_v17 }
  0x73   :  { %674 = vmatpush1.bf16.msra.mxu1 %v1495_v50  ;;  %910 = vmatpush1.bf16.msra.mxu0 %v1543_v18 }
  0x74   :  { %675 = vmatprep.subr.bf16.mxu1 %v1500_v51  ;;  %911 = vmatprep.subr.bf16.mxu0 %v1548_v19 }
  0x77   :  { %676 = vmatpush1.bf16.msra.mxu1 %v1498_v52  ;;  %912 = vmatpush1.bf16.msra.mxu0 %v1546_v20 }
  0x78   :  { %677 = vmatprep.subr.bf16.mxu1 %v1503_v53  ;;  %913 = vmatprep.subr.bf16.mxu0 %v1551_v21 }
  0x7b   :  { %678 = vmatpush1.bf16.msra.mxu1 %v1501_v54  ;;  %914 = vmatpush1.bf16.msra.mxu0 %v1549_v22 }
  0x7c   :  { %679 = vmatprep.subr.bf16.mxu1 %v1506_v55  ;;  %915 = vmatprep.subr.bf16.mxu0 %v1554_v23 }
  0x7f   :  { %680 = vmatpush1.bf16.msra.mxu1 %v1504_v56  ;;  %916 = vmatpush1.bf16.msra.mxu0 %v1552_v24  ;;  %v1569_v24 = vld [vmem:[#allocation7 + $0x2e4] ss:$8 sps:$4 sm:$0xff]  }
  0x80   :  { %681 = vmatprep.subr.bf16.mxu1 %v1509_v57  ;;  %917 = vmatprep.subr.bf16.mxu0 %v1557_v25  ;;  %v1567_v25 = vld [vmem:[#allocation7 + $0x2e0] ss:$8 sps:$4 sm:$0xff]  }
  0x83   :  { %682 = vmatpush1.bf16.msra.mxu1 %v1507_v58  ;;  %918 = vmatpush1.bf16.msra.mxu0 %v1555_v26  ;;  %v1572_v26 = vld [vmem:[#allocation7 + $0x2f4] ss:$8 sps:$4 sm:$0xff]  }
  0x84   :  { %683 = vmatprep.subr.bf16.mxu1 %v1512_v59  ;;  %919 = vmatprep.subr.bf16.mxu0 %v1560_v27  ;;  %v1570_v27 = vld [vmem:[#allocation7 + $0x2f0] ss:$8 sps:$4 sm:$0xff]  }
  0x87   :  { %684 = vmatpush1.bf16.msra.mxu1 %v1510_v60  ;;  %920 = vmatpush1.bf16.msra.mxu0 %v1558_v28  ;;  %v1306_v28 = vld [vmem:[%s1923_s3 + $0x1] ss:$4 sm:$0x3] }
  0x88   :  { %685 = vmatprep.subr.bf16.mxu1 %v1515_v61  ;;  %921 = vmatprep.subr.bf16.mxu0 %v1563_v29  ;;  %v494_v29 = vrot.slane %v1306_v28, %v1820_v37 }
  0x8b   :  { %686 = vmatpush1.bf16.msra.mxu1 %v1513_v62  ;;  %922 = vmatpush1.bf16.msra.mxu0 %v1561_v30  ;;  %v498_v30 = vrot.slane %v1306_v28, %v1825_v41 }
  0x8c   :  { %687 = vmatprep.subr.bf16.mxu1 %v1518_v63  ;;  %923 = vmatprep.subr.bf16.mxu0 %v1566_v31 }
  0x8f   :  { %688 = vmatpush1.bf16.msra.mxu1 %v1516_v0  ;;  %924 = vmatpush1.bf16.msra.mxu0 %v1564_v32 }
  0x90   :  { %689 = vmatprep.subr.bf16.mxu1 %v1521_v1  ;;  %925 = vmatprep.subr.bf16.mxu0 %v1569_v24 }
  0x93   :  { %690 = vmatpush1.bf16.msra.mxu1 %v1519_v2  ;;  %926 = vmatpush1.bf16.msra.mxu0 %v1567_v25 }
  0x94   :  { %691 = vmatprep.subr.bf16.mxu1 %v1524_v3  ;;  %927 = vmatprep.subr.bf16.mxu0 %v1572_v26 }
  0x97   :  { %692 = vmatpush1.bf16.msra.mxu1 %v1522_v4  ;;  %928 = vmatpush1.bf16.msra.mxu0 %v1570_v27 }
 0x12c   :  { %v295_v43 = vpop.f32.mrb[0].mxu1  ;;  %v440_v44 = vpop.f32.mrb[0].mxu0 }
 0x12d   :  { %v441_v46 = vadd.f32 %v440_v44, %v295_v43  ;;  %v297_v47 = vpop.f32.mrb[1].mxu1  ;;  %v442_v48 = vpop.f32.mrb[1].mxu0 }
 0x12e   :  { %v443_v49 = vadd.f32 %v442_v48, %v297_v47  ;;  %v299_v50 = vpop.f32.mrb[2].mxu1  ;;  %v444_v51 = vpop.f32.mrb[2].mxu0 }
 0x12f   :  { %v470_v52 = vadd.f32 %v463_v42, %v441_v46  ;;  %v445_v53 = vadd.f32 %v444_v51, %v299_v50  ;;  %v301_v54 = vpop.f32.mrb[3].mxu1  ;;  %v446_v55 = vpop.f32.mrb[3].mxu0 }
 0x130   :  { %v471_v56 = vadd.f32 %v467_v45, %v443_v49  ;;  %v447_v57 = vadd.f32 %v446_v55, %v301_v54 }
 0x131   :  { %v472_v58 = vadd.f32 %v463_v42, %v445_v53  ;;  %v478_v60 = vmax.f32 %v470_v52, 0.0 }
 0x132   :  { %v473_v59 = vadd.f32 %v467_v45, %v447_v57  ;;  %v479_v62 = vmax.f32 %v471_v56, 0.0 }
 0x133   :  { %v480_v61 = vmax.f32 %v472_v58, 0.0 }
 0x134   :  { %v481_v63 = vmax.f32 %v473_v59, 0.0  ;;  %v305_v0 = vpop.f32.mrb[4].mxu1  ;;  %v450_v1 = vpop.f32.mrb[4].mxu0 }
 0x135   :  { %v486_v2 = vpack.c.bf16 %v480_v61, %v478_v60  ;;  %v451_v3 = vadd.f32 %v450_v1, %v305_v0  ;;  %v307_v4 = vpop.f32.mrb[5].mxu1  ;;  %v452_v5 = vpop.f32.mrb[5].mxu0  ;;  %v1307_v1 = vld [vmem:[%s1923_s3 + $0x2] ss:$4 sm:$0x3]  ;;  %s1735_s3 = smov [#allocation8]  }
 0x136   :  { %v453_v6 = vadd.f32 %v452_v5, %v307_v4  ;;  %v309_v7 = vpop.f32.mrb[6].mxu1  ;;  %v454_v8 = vpop.f32.mrb[6].mxu0  ;;  %v487_v9 = vpack.c.bf16 %v481_v63, %v479_v62  ;;  %s1296_s6 = sshll.u32 %s1735_s3, 4  ;;  %s1297_s6 = int_to_ptr.vmem [resolvable:$true] %s1296_s6 }
 0x137   :  { %v474_v10 = vadd.f32 %v463_v42, %v451_v3  ;;  %v455_v11 = vadd.f32 %v454_v8, %v309_v7  ;;  %v311_v12 = vpop.f32.mrb[7].mxu1  ;;  %v456_v13 = vpop.f32.mrb[7].mxu0  ;;  %v734_v3 = vrot.slane %v1307_v1, %v1825_v41  ;;  %s1699_s7 = scalar_lea.vmem %s1297_s6, 128  ;;  %p1704_p11 = scmp.lt.s32.totalorder %s1297_s6, %s1297_s6 }
 0x138   :  { %v475_v14 = vadd.f32 %v467_v45, %v453_v6  ;;  %v457_v15 = vadd.f32 %v456_v13, %v311_v12  ;;  %693 = vmatprep.mubr.bf16.mxu1 %v487_v9  ;;  %p1700_p10 = scmp.ne.s32.totalorder %s1297_s6, %s1699_s7  ;;  %p1705_p12 = scmp.lt.s32.totalorder %s1699_s7, %s1699_s7 }
 0x139   :  { %v476_v16 = vadd.f32 %v463_v42, %v455_v11  ;;  %694 = vmatmul.mubr.bf16.vlgmr.msra.gmra.mrb[8].mxu1 %v486_v2  ;;  %v482_v18 = vmax.f32 %v474_v10, 0.0  ;;  %v730_v2 = vrot.slane %v1307_v1, %v1820_v37 }
 0x13a   :  { %v477_v17 = vadd.f32 %v467_v45, %v457_v15  ;;  %v483_v20 = vmax.f32 %v475_v14, 0.0  ;;  %p1706_p13 = por %p1705_p12, %p1704_p11 }
 0x13b   :  { %v484_v19 = vmax.f32 %v476_v16, 0.0 }
 0x13c   :  { %v485_v21 = vmax.f32 %v477_v17, 0.0  ;;  %p1707_p0 = pnand %p1706_p13, %p1700_p10 }
 0x13d   :  { %v488_v22 = vpack.c.bf16 %v484_v19, %v482_v18 }
 0x13e   :  { %v489_v23 = vpack.c.bf16 %v485_v21, %v483_v20 }
 0x140   :  { %703 = vmatprep.mubr.bf16.mxu1 %v489_v23 }
 0x141   :  { %704 = vmatmul.mubr.bf16.gmra.mrb[12].mxu1 %v488_v22 }
 0x20c   :  { %v695_v31 = vpop.f32.mrb[8].mxu1 }
 0x20d   :  { %v696_v32 = vadd.f32 %v695_v31, %v494_v29  ;;  %v697_v35 = vpop.f32.mrb[9].mxu1 }
 0x20e   :  { %v698_v36 = vadd.f32 %v697_v35, %v498_v30  ;;  %v699_v40 = vpop.f32.mrb[10].mxu1 }
 0x20f   :  { %v700_v42 = vadd.f32 %v699_v40, %v494_v29  ;;  %v701_v43 = vpop.f32.mrb[11].mxu1  ;;  %v714_v45 = vmax.f32 %v696_v32, 0.0 }
 0x210   :  { %v702_v44 = vadd.f32 %v701_v43, %v498_v30  ;;  %v715_v47 = vmax.f32 %v698_v36, 0.0 }
 0x211   :  { %v716_v46 = vmax.f32 %v700_v42, 0.0 }
 0x212   :  { %v717_v48 = vmax.f32 %v702_v44, 0.0 }
 0x213   :  { %v722_v49 = vpack.c.bf16 %v716_v46, %v714_v45 }
 0x214   :  { %v723_v50 = vpack.c.bf16 %v717_v48, %v715_v47  ;;  %v705_v51 = vpop.f32.mrb[12].mxu1 }
 0x215   :  { %v706_v52 = vadd.f32 %v705_v51, %v494_v29  ;;  %v707_v53 = vpop.f32.mrb[13].mxu1 }
 0x216   :  { %v708_v54 = vadd.f32 %v707_v53, %v498_v30  ;;  %v709_v55 = vpop.f32.mrb[14].mxu1  ;;  %929 = vmatprep.mubr.bf16.mxu0 %v723_v50 }
 0x217   :  { %v710_v56 = vadd.f32 %v709_v55, %v494_v29  ;;  %v711_v57 = vpop.f32.mrb[15].mxu1  ;;  %930 = vmatmul.mubr.bf16.vlgmr.msra.gmra.mrb[8].mxu0 %v722_v49  ;;  %v718_v59 = vmax.f32 %v706_v52, 0.0 }
 0x218   :  { %v712_v58 = vadd.f32 %v711_v57, %v498_v30  ;;  %v719_v61 = vmax.f32 %v708_v54, 0.0 }
 0x219   :  { %v720_v60 = vmax.f32 %v710_v56, 0.0 }
 0x21a   :  { %v721_v62 = vmax.f32 %v712_v58, 0.0 }
 0x21b   :  { %v724_v63 = vpack.c.bf16 %v720_v60, %v718_v59 }
 0x21c   :  { %v725_v0 = vpack.c.bf16 %v721_v62, %v719_v61 }
 0x21e   :  { %939 = vmatprep.mubr.bf16.mxu0 %v725_v0 }
 0x21f   :  { %940 = vmatmul.mubr.bf16.gmra.mrb[12].mxu0 %v724_v63 }
 0x2ea   :  { %v931_v4 = vpop.f32.mrb[8].mxu0 }
 0x2eb   :  { %v932_v5 = vadd.f32 %v931_v4, %v730_v2  ;;  %v933_v6 = vpop.f32.mrb[9].mxu0 }
 0x2ec   :  { %v934_v7 = vadd.f32 %v933_v6, %v734_v3  ;;  %v935_v8 = vpop.f32.mrb[10].mxu0 }
 0x2ed   :  { %v950_v9 = vrot.slane %v932_v5, 4  ;;  %v936_v10 = vadd.f32 %v935_v8, %v730_v2  ;;  %v937_v11 = vpop.f32.mrb[11].mxu0 }
 0x2ee   :  { %v956_v12 = vrot.slane %v934_v7, 4  ;;  %v938_v13 = vadd.f32 %v937_v11, %v734_v3 }
 0x2ef   :  { %v951_v14 = vmax.f32 %v932_v5, %v950_v9  ;;  %v962_v15 = vrot.slane %v936_v10, 4 }
 0x2f0   :  { %v957_v16 = vmax.f32 %v934_v7, %v956_v12  ;;  %v968_v17 = vrot.slane %v938_v13, 4 }
 0x2f1   :  { %v952_v18 = vrot.slane %v951_v14, 2  ;;  %v963_v19 = vmax.f32 %v936_v10, %v962_v15 }
 0x2f2   :  { %v958_v20 = vrot.slane %v957_v16, 2  ;;  %v969_v37 = vmax.f32 %v938_v13, %v968_v17  ;;  %v941_v21 = vpop.f32.mrb[12].mxu0 }
 0x2f3   :  { %v953_v41 = vmax.f32 %v951_v14, %v952_v18  ;;  %v964_v22 = vrot.slane %v963_v19, 2  ;;  %v942_v23 = vadd.f32 %v941_v21, %v730_v2  ;;  %v943_v24 = vpop.f32.mrb[13].mxu0 }
 0x2f4   :  { %v959_v25 = vmax.f32 %v957_v16, %v958_v20  ;;  %v970_v26 = vrot.slane %v969_v37, 2  ;;  %v944_v27 = vadd.f32 %v943_v24, %v734_v3  ;;  %v945_v28 = vpop.f32.mrb[14].mxu0 }
 0x2f5   :  { %v954_v29 = vrot.slane %v953_v41, 1  ;;  %v965_v30 = vmax.f32 %v963_v19, %v964_v22  ;;  %v974_v31 = vrot.slane %v942_v23, 4  ;;  %v946_v32 = vadd.f32 %v945_v28, %v730_v2  ;;  %v947_v35 = vpop.f32.mrb[15].mxu0 }
 0x2f6   :  { %v960_v36 = vrot.slane %v959_v25, 1  ;;  %v971_v40 = vmax.f32 %v969_v37, %v970_v26  ;;  %v980_v42 = vrot.slane %v944_v27, 4  ;;  %v948_v43 = vadd.f32 %v947_v35, %v734_v3 }
 0x2f7   :  { %v955_v44 = vmax.f32 %v953_v41, %v954_v29  ;;  %v966_v45 = vrot.slane %v965_v30, 1  ;;  %v975_v46 = vmax.f32 %v942_v23, %v974_v31  ;;  %v986_v47 = vrot.slane %v946_v32, 4 }
 0x2f8   :  { %v961_v48 = vmax.f32 %v959_v25, %v960_v36  ;;  %v972_v49 = vrot.slane %v971_v40, 1  ;;  %v981_v50 = vmax.f32 %v944_v27, %v980_v42  ;;  %v992_v51 = vrot.slane %v948_v43, 4 }
 0x2f9   :  { %v998_v52 = vsub.f32 %v932_v5, %v955_v44  ;;  %v967_v53 = vmax.f32 %v965_v30, %v966_v45  ;;  %v976_v54 = vrot.slane %v975_v46, 2  ;;  %v987_v55 = vmax.f32 %v946_v32, %v986_v47 }
 0x2fa   :  { %v999_v56 = vsub.f32 %v934_v7, %v961_v48  ;;  %v973_v57 = vmax.f32 %v971_v40, %v972_v49  ;;  %v982_v58 = vrot.slane %v981_v50, 2  ;;  %v993_v59 = vmax.f32 %v948_v43, %v992_v51 }
 0x2fb   :  { %v1006_v60 = vmul.f32 1.442695, %v998_v52  ;;  %v1000_v61 = vsub.f32 %v936_v10, %v967_v53  ;;  %v977_v62 = vmax.f32 %v975_v46, %v976_v54  ;;  %v988_v63 = vrot.slane %v987_v55, 2 }
 0x2fc   :  { %v1008_v0 = vmul.f32 1.442695, %v999_v56  ;;  %v1001_v1 = vsub.f32 %v938_v13, %v973_v57  ;;  %v983_v2 = vmax.f32 %v981_v50, %v982_v58  ;;  %v994_v3 = vrot.slane %v993_v59, 2 }
 0x2fd   :  { %1577 = vpow2.f32 %v1006_v60  ;;  %v1010_v4 = vmul.f32 1.442695, %v1000_v61  ;;  %v978_v6 = vrot.slane %v977_v62, 1  ;;  %v989_v8 = vmax.f32 %v987_v55, %v988_v63 }
 0x2fe   :  { %1579 = vpow2.f32 %v1008_v0  ;;  %v1012_v5 = vmul.f32 1.442695, %v1001_v1  ;;  %v984_v9 = vrot.slane %v983_v2, 1  ;;  %v995_v11 = vmax.f32 %v993_v59, %v994_v3 }
 0x2ff   :  { %1581 = vpow2.f32 %v1010_v4  ;;  %v979_v7 = vmax.f32 %v977_v62, %v978_v6  ;;  %v990_v12 = vrot.slane %v989_v8, 1 }
 0x300   :  { %1583 = vpow2.f32 %v1012_v5  ;;  %v985_v14 = vmax.f32 %v983_v2, %v984_v9  ;;  %v996_v10 = vrot.slane %v995_v11, 1 }
 0x301   :  { %v1002_v15 = vsub.f32 %v942_v23, %v979_v7  ;;  %v991_v16 = vmax.f32 %v989_v8, %v990_v12 }
 0x302   :  { %v1003_v17 = vsub.f32 %v944_v27, %v985_v14  ;;  %v997_v13 = vmax.f32 %v995_v11, %v996_v10 }
 0x303   :  { %v1014_v18 = vmul.f32 1.442695, %v1002_v15  ;;  %v1004_v19 = vsub.f32 %v946_v32, %v991_v16 }
 0x304   :  { %v1016_v20 = vmul.f32 1.442695, %v1003_v17  ;;  %v1005_v37 = vsub.f32 %v948_v43, %v997_v13 }
 0x305   :  { %1585 = vpow2.f32 %v1014_v18  ;;  %v1018_v21 = vmul.f32 1.442695, %v1004_v19 }
 0x306   :  { %1587 = vpow2.f32 %v1016_v20  ;;  %v1020_v41 = vmul.f32 1.442695, %v1005_v37 }
 0x307   :  { %v1839_v22 = vpop.eup %1577  ;;  %1589 = vpow2.f32 %v1018_v21 }
 0x308   :  { %v1841_v24 = vpop.eup %1579  ;;  %v1022_v25 = vrot.slane %v1839_v22, 4  ;;  %1591 = vpow2.f32 %v1020_v41 }
 0x309   :  { %v1844_v23 = vpop.eup %1581  ;;  %v1028_v26 = vrot.slane %v1841_v24, 4 }
 0x30a   :  { %v1847_v27 = vpop.eup %1583  ;;  %v1023_v28 = vadd.f32 %v1839_v22, %v1022_v25  ;;  %v1034_v29 = vrot.slane %v1844_v23, 4 }
 0x30b   :  { %v1029_v30 = vadd.f32 %v1841_v24, %v1028_v26  ;;  %v1040_v31 = vrot.slane %v1847_v27, 4 }
 0x30c   :  { %v1024_v32 = vrot.slane %v1023_v28, 2  ;;  %v1035_v35 = vadd.f32 %v1844_v23, %v1034_v29 }
 0x30d   :  { %v1030_v36 = vrot.slane %v1029_v30, 2  ;;  %v1041_v40 = vadd.f32 %v1847_v27, %v1040_v31 }
 0x30e   :  { %v1025_v42 = vadd.f32 %v1024_v32, %v1023_v28  ;;  %v1036_v43 = vrot.slane %v1035_v35, 2  ;;  %v1110_v32 = vunpack.c.l.bf16 %v1808_v34 }
 0x30f   :  { %v1855_v44 = vpop.eup %1585  ;;  %v1031_v45 = vadd.f32 %v1030_v36, %v1029_v30  ;;  %v1042_v46 = vrot.slane %v1041_v40, 2 }
 0x310   :  { %v1857_v47 = vpop.eup %1587  ;;  %v1026_v48 = vrot.slane %v1025_v42, 1  ;;  %v1037_v49 = vadd.f32 %v1036_v43, %v1035_v35  ;;  %v1046_v50 = vrot.slane %v1855_v44, 4 }
 0x311   :  { %v1860_v51 = vpop.eup %1589  ;;  %v1032_v52 = vrot.slane %v1031_v45, 1  ;;  %v1043_v53 = vadd.f32 %v1042_v46, %v1041_v40  ;;  %v1052_v54 = vrot.slane %v1857_v47, 4  ;;  %v1114_v40 = vunpack.c.l.bf16 %v1806_v33 }
 0x312   :  { %v1863_v55 = vpop.eup %1591  ;;  %v1038_v56 = vrot.slane %v1037_v49, 1  ;;  %v1047_v57 = vadd.f32 %v1855_v44, %v1046_v50  ;;  %v1058_v58 = vrot.slane %v1860_v51, 4  ;;  %v1027_v59 = vadd.f32 %v1026_v48, %v1025_v42 }
 0x313   :  { %v1033_v60 = vadd.f32 %v1032_v52, %v1031_v45  ;;  %v1044_v61 = vrot.slane %v1043_v53, 1  ;;  %v1053_v62 = vadd.f32 %v1857_v47, %v1052_v54  ;;  %v1064_v63 = vrot.slane %v1863_v55, 4 }
 0x314   :  { %v1048_v0 = vrot.slane %v1047_v57, 2  ;;  %v1059_v1 = vadd.f32 %v1860_v51, %v1058_v58  ;;  %v1039_v2 = vadd.f32 %v1038_v56, %v1037_v49  ;;  %1593 = vrcp.f32 %v1027_v59 }
 0x315   :  { %1595 = vrcp.f32 %v1033_v60  ;;  %v1045_v3 = vadd.f32 %v1044_v61, %v1043_v53  ;;  %v1054_v4 = vrot.slane %v1053_v62, 2  ;;  %v1065_v6 = vadd.f32 %v1863_v55, %v1064_v63 }
 0x316   :  { %v1049_v8 = vadd.f32 %v1048_v0, %v1047_v57  ;;  %v1060_v5 = vrot.slane %v1059_v1, 2  ;;  %1597 = vrcp.f32 %v1039_v2  ;;  %v1111_v45 = vunpack.c.h.bf16 %v1808_v34 }
 0x317   :  { %1599 = vrcp.f32 %v1045_v3  ;;  %v1055_v9 = vadd.f32 %v1054_v4, %v1053_v62  ;;  %v1066_v11 = vrot.slane %v1065_v6, 2  ;;  %v1115_v50 = vunpack.c.h.bf16 %v1806_v33 }
 0x318   :  { %v1050_v7 = vrot.slane %v1049_v8, 1  ;;  %v1061_v12 = vadd.f32 %v1060_v5, %v1059_v1 }
 0x319   :  { %v1056_v14 = vrot.slane %v1055_v9, 1  ;;  %v1067_v10 = vadd.f32 %v1066_v11, %v1065_v6  ;;  %v1117_v11 = vunpack.c.h.bf16 %v1812_v38 }
 0x31a   :  { %v1051_v15 = vadd.f32 %v1050_v7, %v1049_v8  ;;  %v1062_v16 = vrot.slane %v1061_v12, 1 }
 0x31b   :  { %v1057_v17 = vadd.f32 %v1056_v14, %v1055_v9  ;;  %v1068_v13 = vrot.slane %v1067_v10, 1 }
 0x31c   :  { %v1063_v18 = vadd.f32 %v1062_v16, %v1061_v12  ;;  %1601 = vrcp.f32 %v1051_v15 }
 0x31d   :  { %1603 = vrcp.f32 %v1057_v17  ;;  %v1069_v19 = vadd.f32 %v1068_v13, %v1067_v10 }
 0x31e   :  { %v1594_v20 = vpop.eup %1593  ;;  %1605 = vrcp.f32 %v1063_v18 }
 0x31f   :  { %v1596_v37 = vpop.eup %1595  ;;  %1607 = vrcp.f32 %v1069_v19  ;;  %v1078_v21 = vmul.f32 %v1594_v20, %v1027_v59 }
 0x320   :  { %v1598_v41 = vpop.eup %1597  ;;  %v1079_v25 = vmul.f32 %v1596_v37, %v1033_v60 }
 0x321   :  { %v1600_v26 = vpop.eup %1599  ;;  %v1080_v28 = vmul.f32 %v1598_v41, %v1039_v2  ;;  %v1086_v29 = vsub.f32 2.0, %v1078_v21 }
 0x322   :  { %v1087_v30 = vsub.f32 2.0, %v1079_v25  ;;  %v1081_v31 = vmul.f32 %v1600_v26, %v1045_v3 }
 0x323   :  { %v1088_v35 = vsub.f32 2.0, %v1080_v28  ;;  %v1094_v36 = vmul.f32 %v1594_v20, %v1086_v29 }
 0x324   :  { %v1095_v42 = vmul.f32 %v1596_v37, %v1087_v30  ;;  %v1089_v43 = vsub.f32 2.0, %v1081_v31 }
 0x325   :  { %v1096_v46 = vmul.f32 %v1598_v41, %v1088_v35  ;;  %v1102_v48 = vmul.f32 %v1839_v22, %v1094_v36 }
 0x326   :  { %v1602_v49 = vpop.eup %1601  ;;  %v1103_v52 = vmul.f32 %v1841_v24, %v1095_v42  ;;  %v1097_v53 = vmul.f32 %v1600_v26, %v1089_v43  ;;  %v1112_v24 = vunpack.c.l.bf16 %v1816_v39 }
 0x327   :  { %v1604_v54 = vpop.eup %1603  ;;  %v1082_v56 = vmul.f32 %v1602_v49, %v1051_v15  ;;  %v1104_v57 = vmul.f32 %v1844_v23, %v1096_v46  ;;  %v1118_v58 = vmul.f32 %v1110_v32, %v1102_v48  ;;  %v1116_v23 = vunpack.c.l.bf16 %v1812_v38 }
 0x328   :  { %v1606_v59 = vpop.eup %1605  ;;  %v1105_v60 = vmul.f32 %v1847_v27, %v1097_v53  ;;  %v1083_v61 = vmul.f32 %v1604_v54, %v1057_v17  ;;  %v1122_v62 = vmul.f32 %v1114_v40, %v1103_v52  ;;  %v1113_v27 = vunpack.c.h.bf16 %v1816_v39 }
 0x329   :  { %v1608_v34 = vpop.eup %1607  ;;  %v1084_v63 = vmul.f32 %v1606_v59, %v1063_v18  ;;  %v1090_v0 = vsub.f32 2.0, %v1082_v56  ;;  %v1119_v22 = vmul.f32 %v1111_v45, %v1104_v57 }
 0x32a   :  { %v1085_v1 = vmul.f32 %v1608_v34, %v1069_v19  ;;  %v1091_v2 = vsub.f32 2.0, %v1083_v61  ;;  %v1123_v33 = vmul.f32 %v1115_v50, %v1105_v60  ;;  %1609 = vrcp.f32 %v1122_v62 }
 0x32b   :  { %v1092_v3 = vsub.f32 2.0, %v1084_v63  ;;  %v1098_v4 = vmul.f32 %v1602_v49, %v1090_v0 }
 0x32c   :  { %v1093_v6 = vsub.f32 2.0, %v1085_v1  ;;  %v1099_v8 = vmul.f32 %v1604_v54, %v1091_v2  ;;  %1611 = vrcp.f32 %v1123_v33 }
 0x32d   :  { %v1100_v5 = vmul.f32 %v1606_v59, %v1092_v3  ;;  %v1106_v9 = vmul.f32 %v1855_v44, %v1098_v4 }
 0x32e   :  { %v1101_v7 = vmul.f32 %v1608_v34, %v1093_v6  ;;  %v1107_v12 = vmul.f32 %v1857_v47, %v1099_v8 }
 0x32f   :  { %v1108_v14 = vmul.f32 %v1860_v51, %v1100_v5  ;;  %v1120_v10 = vmul.f32 %v1112_v24, %v1106_v9 }
 0x330   :  { %v1109_v15 = vmul.f32 %v1863_v55, %v1101_v7  ;;  %v1124_v16 = vmul.f32 %v1116_v23, %v1107_v12 }
 0x331   :  { %v1121_v17 = vmul.f32 %v1113_v27, %v1108_v14 }
 0x332   :  { %v1125_v13 = vmul.f32 %v1117_v11, %v1109_v15  ;;  %1613 = vrcp.f32 %v1124_v16 }
 0x334   :  { %v1610_v18 = vpop.eup %1609  ;;  %1615 = vrcp.f32 %v1125_v13 }
 0x335   :  { %v1130_v39 = vmul.f32 %v1610_v18, %v1122_v62 }
 0x336   :  { %v1612_v19 = vpop.eup %1611 }
 0x337   :  { %v1131_v20 = vmul.f32 %v1612_v19, %v1123_v33  ;;  %v1134_v44 = vsub.f32 2.0, %v1130_v39 }
 0x339   :  { %v1135_v37 = vsub.f32 2.0, %v1131_v20  ;;  %v1138_v38 = vmul.f32 %v1610_v18, %v1134_v44 }
 0x33b   :  { %v1139_v21 = vmul.f32 %v1612_v19, %v1135_v37  ;;  %v1142_v41 = vmul.f32 %v1138_v38, %v1118_v58 }
 0x33c   :  { %v1614_v47 = vpop.eup %1613 }
 0x33d   :  { %v1132_v25 = vmul.f32 %v1614_v47, %v1124_v16  ;;  %v1143_v51 = vmul.f32 %v1139_v21, %v1119_v22  ;;  %v1170_v26 = vmul.f32 %v1142_v41, %v1138_v38  ;;  %v1146_v45 = vrot.slane %v1142_v41, 4 }
 0x33e   :  { %v1616_v28 = vpop.eup %1615 }
 0x33f   :  { %v1133_v55 = vmul.f32 %v1616_v28, %v1125_v13  ;;  %v1136_v29 = vsub.f32 2.0, %v1132_v25  ;;  %v1171_v30 = vmul.f32 %v1143_v51, %v1139_v21  ;;  %v1174_v31 = vrot.slane %v1170_v26, 4 }
 0x340   :  { %v1152_v50 = vrot.slane %v1143_v51, 4  ;;  %v1147_v56 = vadd.f32 %v1146_v45, %v1142_v41 }
 0x341   :  { %v1137_v32 = vsub.f32 2.0, %v1133_v55  ;;  %v1140_v35 = vmul.f32 %v1614_v47, %v1136_v29  ;;  %v1175_v36 = vadd.f32 %v1174_v31, %v1170_v26  ;;  %v1180_v40 = vrot.slane %v1171_v30, 4 }
 0x342   :  { %v1153_v61 = vadd.f32 %v1152_v50, %v1143_v51  ;;  %v1148_v1 = vrot.slane %v1147_v56, 2 }
 0x343   :  { %v1141_v42 = vmul.f32 %v1616_v28, %v1137_v32  ;;  %v1144_v43 = vmul.f32 %v1140_v35, %v1120_v10  ;;  %v1176_v46 = vrot.slane %v1175_v36, 2  ;;  %v1181_v48 = vadd.f32 %v1180_v40, %v1171_v30 }
 0x344   :  { %v1154_v4 = vrot.slane %v1153_v61, 2  ;;  %v1149_v27 = vadd.f32 %v1148_v1, %v1147_v56 }
 0x345   :  { %v1145_v49 = vmul.f32 %v1141_v42, %v1121_v17  ;;  %v1172_v52 = vmul.f32 %v1144_v43, %v1140_v35  ;;  %v1177_v53 = vadd.f32 %v1176_v46, %v1175_v36  ;;  %v1182_v54 = vrot.slane %v1181_v48, 2 }
 0x346   :  { %v1158_v62 = vrot.slane %v1144_v43, 4  ;;  %v1155_v7 = vadd.f32 %v1154_v4, %v1153_v61  ;;  %v1150_v15 = vrot.slane %v1149_v27, 1 }
 0x347   :  { %v1173_v57 = vmul.f32 %v1145_v49, %v1141_v42  ;;  %v1178_v58 = vrot.slane %v1177_v53, 1  ;;  %v1183_v59 = vadd.f32 %v1182_v54, %v1181_v48  ;;  %v1186_v60 = vrot.slane %v1172_v52, 4 }
 0x348   :  { %v1164_v2 = vrot.slane %v1145_v49, 4  ;;  %v1159_v23 = vadd.f32 %v1158_v62, %v1144_v43  ;;  %v1156_v13 = vrot.slane %v1155_v7, 1  ;;  %v1887_v19 = vadd.f32 %v1150_v15, %v1149_v27 }
 0x349   :  { %v1179_v34 = vadd.f32 %v1178_v58, %v1177_v53  ;;  %v1184_v63 = vrot.slane %v1183_v59, 1  ;;  %v1187_v0 = vadd.f32 %v1186_v60, %v1172_v52  ;;  %v1192_v22 = vrot.slane %v1173_v57, 4 }
 0x34a   :  { %v1165_v5 = vadd.f32 %v1164_v2, %v1145_v49  ;;  %v1160_v12 = vrot.slane %v1159_v23, 2  ;;  %v1889_v38 = vadd.f32 %v1156_v13, %v1155_v7  ;;  %v1198_v25 = vmul.f32 %v1887_v19, %v1887_v19 }
 0x34b   :  { %v1185_v33 = vadd.f32 %v1184_v63, %v1183_v59  ;;  %v1188_v24 = vrot.slane %v1187_v0, 2  ;;  %v1193_v3 = vadd.f32 %v1192_v22, %v1173_v57  ;;  %1617 = vrcp.f32 %v1179_v34 }
 0x34c   :  { %v1166_v16 = vrot.slane %v1165_v5, 2  ;;  %v1161_v39 = vadd.f32 %v1160_v12, %v1159_v23  ;;  %v1199_v55 = vmul.f32 %v1889_v38, %v1889_v38 }
 0x34d   :  { %v1189_v6 = vadd.f32 %v1188_v24, %v1187_v0  ;;  %v1194_v8 = vrot.slane %v1193_v3, 2  ;;  %1619 = vrcp.f32 %v1185_v33 }
 0x34e   :  { %v1167_v37 = vadd.f32 %v1166_v16, %v1165_v5  ;;  %v1162_v47 = vrot.slane %v1161_v39, 1 }
 0x34f   :  { %v1190_v9 = vrot.slane %v1189_v6, 1  ;;  %v1195_v11 = vadd.f32 %v1194_v8, %v1193_v3 }
 0x350   :  { %v1168_v28 = vrot.slane %v1167_v37, 1  ;;  %v1895_v32 = vadd.f32 %v1162_v47, %v1161_v39 }
 0x351   :  { %v1191_v14 = vadd.f32 %v1190_v9, %v1189_v6  ;;  %v1196_v10 = vrot.slane %v1195_v11, 1 }
 0x352   :  { %v1169_v45 = vadd.f32 %v1168_v28, %v1167_v37  ;;  %v1200_v52 = vmul.f32 %v1895_v32, %v1895_v32 }
 0x353   :  { %v1197_v17 = vadd.f32 %v1196_v10, %v1195_v11  ;;  %1621 = vrcp.f32 %v1191_v14 }
 0x354   :  { %v1201_v56 = vmul.f32 %v1169_v45, %v1169_v45 }
 0x355   :  { %v1618_v18 = vpop.eup %1617  ;;  %1623 = vrcp.f32 %v1197_v17 }
 0x356   :  { %v1206_v20 = vmul.f32 %v1618_v18, %v1179_v34 }
 0x357   :  { %v1620_v44 = vpop.eup %1619 }
 0x358   :  { %v1207_v21 = vmul.f32 %v1620_v44, %v1185_v33  ;;  %v1210_v41 = vsub.f32 2.0, %v1206_v20 }
 0x35a   :  { %v1211_v51 = vsub.f32 2.0, %v1207_v21  ;;  %v1214_v26 = vmul.f32 %v1618_v18, %v1210_v41 }
 0x35c   :  { %v1215_v29 = vmul.f32 %v1620_v44, %v1211_v51  ;;  %v1218_v30 = vmul.f32 %v1214_v26, %v1198_v25 }
 0x35d   :  { %v1622_v31 = vpop.eup %1621 }
 0x35e   :  { %v1208_v35 = vmul.f32 %v1622_v31, %v1191_v14  ;;  %v1219_v36 = vmul.f32 %v1215_v29, %v1199_v55  ;;  %v1222_v40 = vmul.f32 8.0, %v1218_v30  ;;  %v1246_v42 = vand.u32 2147483647, %v1218_v30 }
 0x35f   :  { %v1624_v43 = vpop.eup %1623 }
 0x360   :  { %v1209_v46 = vmul.f32 %v1624_v43, %v1197_v17  ;;  %v1212_v48 = vsub.f32 2.0, %v1208_v35  ;;  %v1223_v49 = vmul.f32 8.0, %v1219_v36  ;;  %1625 = vrcp.f32 %v1222_v40 }
 0x361   :  { %v1247_v50 = vand.u32 2147483647, %v1219_v36  ;;  %vm1250_vm0 = vcmp.lt.f32.partialorder %v1246_v42, 0.0001 }
 0x362   :  { %v1213_v53 = vsub.f32 2.0, %v1209_v46  ;;  %v1216_v54 = vmul.f32 %v1622_v31, %v1212_v48  ;;  %1627 = vrcp.f32 %v1223_v49  ;;  %v1254_v59 = vsel %vm1250_vm0, 0.0001, %v1218_v30 }
 0x363   :  { %vm1251_vm2 = vcmp.lt.f32.partialorder %v1247_v50, 0.0001 }
 0x364   :  { %v1217_v57 = vmul.f32 %v1624_v43, %v1213_v53  ;;  %v1220_v58 = vmul.f32 %v1216_v54, %v1200_v52  ;;  %v1255_v60 = vsel %vm1251_vm2, 0.0001, %v1219_v36 }
 0x365   :  { %v1275_v61 = vsel %vm1274_vm1, %v1255_v60, %v1254_v59 }
 0x366   :  { %v1221_v62 = vmul.f32 %v1217_v57, %v1201_v56  ;;  %v1224_v34 = vmul.f32 8.0, %v1220_v58  ;;  %v1248_v63 = vand.u32 2147483647, %v1220_v58 }
 0x368   :  { %v1225_v0 = vmul.f32 8.0, %v1221_v62  ;;  %1629 = vrcp.f32 %v1224_v34  ;;  %v1249_v22 = vand.u32 2147483647, %v1221_v62  ;;  %vm1252_vm4 = vcmp.lt.f32.partialorder %v1248_v63, 0.0001 }
 0x369   :  { %v1256_v1 = vsel %vm1252_vm4, 0.0001, %v1220_v58 }
 0x36a   :  { %v1626_v2 = vpop.eup %1625  ;;  %1631 = vrcp.f32 %v1225_v0  ;;  %vm1253_vm6 = vcmp.lt.f32.partialorder %v1249_v22, 0.0001  ;;  %v1277_v33 = vsel %vm1276_vm3, %v1256_v1, %v1275_v61 }
 0x36b   :  { %v1230_v24 = vmul.f32 %v1626_v2, %v1222_v40  ;;  %v1257_v3 = vsel %vm1253_vm6, 0.0001, %v1221_v62 }
 0x36c   :  { %v1628_v4 = vpop.eup %1627  ;;  %v1279_v23 = vsel %vm1278_vm5, %v1257_v3, %v1277_v33 }
 0x36d   :  { %v1231_v6 = vmul.f32 %v1628_v4, %v1223_v49  ;;  %v1234_v8 = vsub.f32 2.0, %v1230_v24 }
 0x36f   :  { %v1235_v27 = vsub.f32 2.0, %v1231_v6  ;;  %v1238_v5 = vmul.f32 %v1626_v2, %v1234_v8 }
 0x371   :  { %v1239_v9 = vmul.f32 %v1628_v4, %v1235_v27  ;;  %v1242_v11 = vmul.f32 %v1238_v5, %v1887_v19 }
 0x372   :  { %v1630_v7 = vpop.eup %1629 }
 0x373   :  { %v1232_v12 = vmul.f32 %v1630_v7, %v1224_v34  ;;  %v1243_v14 = vmul.f32 %v1239_v9, %v1889_v38  ;;  %v1258_v10 = vand.u32 2147483647, %v1242_v11 }
 0x374   :  { %v1632_v15 = vpop.eup %1631 }
 0x375   :  { %v1233_v16 = vmul.f32 %v1632_v15, %v1225_v0  ;;  %v1236_v17 = vsub.f32 2.0, %v1232_v12  ;;  %v1259_v13 = vand.u32 2147483647, %v1243_v14  ;;  %vm1262_vm7 = vcmp.lt.f32.partialorder %v1258_v10, 0.0001 }
 0x376   :  { %v1266_v20 = vsel %vm1262_vm7, 0.0001, %v1242_v11 }
 0x377   :  { %v1237_v18 = vsub.f32 2.0, %v1233_v16  ;;  %v1240_v39 = vmul.f32 %v1630_v7, %v1236_v17  ;;  %vm1263_vm8 = vcmp.lt.f32.partialorder %v1259_v13, 0.0001 }
 0x378   :  { %v1267_v44 = vsel %vm1263_vm8, 0.0001, %v1243_v14 }
 0x379   :  { %v1241_v37 = vmul.f32 %v1632_v15, %v1237_v18  ;;  %v1244_v21 = vmul.f32 %v1240_v39, %v1895_v32  ;;  %v1284_v19 = vsel %vm1274_vm1, %v1267_v44, %v1266_v20 }
 0x37b   :  { %v1245_v41 = vmul.f32 %v1241_v37, %v1169_v45  ;;  %v1260_v47 = vand.u32 2147483647, %v1244_v21 }
 0x37d   :  { %v1261_v25 = vand.u32 2147483647, %v1245_v41  ;;  %vm1264_vm9 = vcmp.lt.f32.partialorder %v1260_v47, 0.0001 }
 0x37e   :  { %v1268_v38 = vsel %vm1264_vm9, 0.0001, %v1244_v21 }
 0x37f   :  { %vm1265_vm10 = vcmp.lt.f32.partialorder %v1261_v25, 0.0001  ;;  %v1285_v51 = vsel %vm1276_vm3, %v1268_v38, %v1284_v19 }
 0x380   :  { %v1269_v26 = vsel %vm1265_vm10, 0.0001, %v1245_v41 }
 0x381   :  { %v1286_v28 = vsel %vm1278_vm5, %v1269_v26, %v1285_v51 }
 0x382   :  { %v1287_v55 = vcombine.low %v1279_v23, %v1286_v28 }
 0x384   :  { %1289 = vst [vmem:[#allocation8] sm:$0xff] %v1287_v55 }
 0x385   :  { %1710 = shalt.err (!%p1707_p0)
}
 0x386   :  { %s1711_s10 = scalar_lea.hbm %s1924_s4, 128 }
 0x387   :  { %p1712_p1 = scmp.ne.s32.totalorder %s1924_s4, %s1711_s10  ;;  %p1715_p2 = scmp.lt.u32.totalorder %s1711_s10, %s1924_s4 }
 0x389   :  { %p1717_p3 = pnand %p1715_p2, %p1712_p1 }
 0x38b   :  { %1720 = shalt.err (!%p1717_p3)
}
 0x38c   :  { %1299 = dma.vmem_to_hbm [thread:$0]  %s1297_s6, 128, %s1924_s4, [#allocation4]  }
 0x38d   :  { %1725 = dma.done.wait [#allocation4], 128  }
 0x38e   :  { %1726 = vsyncadd [#allocation4], 4294967168 }
 0x38f   :  { %1303 = vsyncpa [#allocation3], 1 }
 0x390   :  { %1304 = vsyncpa [#allocation6], 1 }
 0x391   :  { %1305 = vsyncpa [#allocation4], 1 }

</bundles_post_ra>
